<compile_context>
chip_gen: v7x
topology: tpu7x:2x2x1
jax: 0.10.0
libtpu: 0.0.40
codegen_flags: <defaults>
</compile_context>

<pallas_src>
import jax
import jax.numpy as jnp
from jax.experimental import pallas as pl
from jax.experimental.pallas import tpu as pltpu

N_STATES = 4
N_ACTIONS = 1
HIDDEN = (16, 32, 16)
OUT_DIM = N_ACTIONS * 2        # 2 (mean, std)
LANES = 128                    # packed-slab lane width

# 8-row-aligned offsets inside the packed parameter slab.
_W1_OFF = 0                    # rows   0:8   (data in 0:4)
_W2_OFF = 8                    # rows   8:136 (data in 8:24,   cols 0:32)
_W3_OFF = 136                  # rows 136:264 (data in 136:168, cols 0:16)
_W4_OFF = 264                  # rows 264:392 (data in 264:280, cols 0:2)
_B1_OFF = 392
_B2_OFF = 400
_B3_OFF = 408
_B4_OFF = 416
SLAB_ROWS = 424                # multiple of 8


def _round_up(x, m):
    return ((x + m - 1) // m) * m


# ---------------------------------------------------------------------------
# Kernel
# ---------------------------------------------------------------------------
def actor_kernel(x_ref, w_ref, out_ref):
    """x_ref: (bb, 4) state tile; w_ref: (424, 128) packed params; out_ref: (bb, 2)."""
    x = x_ref[...]                                   # (bb, 4)

    # Full-lane (128-wide) weight views; padding lanes/rows are zero.
    w1 = w_ref[_W1_OFF:_W1_OFF + N_STATES, :]        # (4, 128)
    w2 = w_ref[_W2_OFF:_W2_OFF + LANES, :]           # (128, 128)
    w3 = w_ref[_W3_OFF:_W3_OFF + LANES, :]           # (128, 128)
    w4 = w_ref[_W4_OFF:_W4_OFF + LANES, :]           # (128, 128)
    b1 = w_ref[_B1_OFF:_B1_OFF + 1, :]               # (1, 128)
    b2 = w_ref[_B2_OFF:_B2_OFF + 1, :]
    b3 = w_ref[_B3_OFF:_B3_OFF + 1, :]
    b4 = w_ref[_B4_OFF:_B4_OFF + 1, :]

    # Lane-dense activations throughout; zero-padded columns stay exactly zero
    # (0 @ w + 0 bias -> tanh(0) = 0), so the math matches the unpadded net.
    h1 = jnp.tanh(jnp.dot(x,  w1, preferred_element_type=jnp.float32) + b1)   # (bb, 128)
    h2 = jnp.tanh(jnp.dot(h1, w2, preferred_element_type=jnp.float32) + b2)   # (bb, 128)
    h3 = jnp.tanh(jnp.dot(h2, w3, preferred_element_type=jnp.float32) + b3)   # (bb, 128)
    out = jnp.dot(h3, w4, preferred_element_type=jnp.float32) + b4            # (bb, 128)

    # Narrow to the 2 useful lanes before the transcendentals / HBM writeback.
    y = out[:, 0:OUT_DIM]                                                     # (bb, 2)
    softplus = jnp.maximum(y, 0.0) + jnp.log(1.0 + jnp.exp(-jnp.abs(y)))      # stable
    lane = jax.lax.broadcasted_iota(jnp.int32, y.shape, 1)
    out_ref[...] = jnp.where(lane == 1, softplus, y)                          # lane0=mean, lane1=std


# ---------------------------------------------------------------------------
# Wrapper
# ---------------------------------------------------------------------------
def actor_net_forward(state, slab, *, block_b=4096):
    """state: (B, n_states) f32, slab: (424, 128) packed params -> (mean (B,1), std (B,1))."""
    B = state.shape[0]

    # Block size: multiple of 8, capped so the parallel batch axis keeps >= 2
    # grid steps when B allows (v7x megacore), and never larger than needed.
    bb = max(8, min(_round_up(block_b, 8), _round_up(pl.cdiv(B, 2), 8)))
    grid_b = pl.cdiv(B, bb)
    b_pad = grid_b * bb
    if b_pad != B:
        state = jnp.pad(state, ((0, b_pad - B), (0, 0)))   # padded rows are discarded below

    y = pl.pallas_call(
        actor_kernel,
        out_shape=jax.ShapeDtypeStruct((b_pad, OUT_DIM), jnp.float32),
        grid=(grid_b,),
        in_specs=[
            pl.BlockSpec((bb, N_STATES), lambda i: (i, 0)),      # state tile
            pl.BlockSpec((SLAB_ROWS, LANES), lambda i: (0, 0)),  # weights stay VMEM-resident
        ],
        out_specs=pl.BlockSpec((bb, OUT_DIM), lambda i: (i, 0)),
        compiler_params=pltpu.CompilerParams(
            dimension_semantics=("parallel",)),
    )(state, slab)

    # torch.split(output, 1, dim=-1) done in the wrapper (pure slicing).
    mean = y[:B, 0:1]
    std = y[:B, 1:2]
    return mean, std


# ---------------------------------------------------------------------------
# Parameter construction / packing
# ---------------------------------------------------------------------------
def init_params(key):
    """Deterministic synthetic parameters (shapes match the PyTorch module)."""
    dims = (N_STATES,) + HIDDEN + (OUT_DIM,)       # 4 -> 16 -> 32 -> 16 -> 2
    params = {}
    keys = jax.random.split(key, 2 * (len(dims) - 1))
    for i, (din, dout) in enumerate(zip(dims[:-1], dims[1:]), start=1):
        bound = 1.0 / jnp.sqrt(jnp.float32(din))   # ~ PyTorch U(-1/sqrt(fan_in), ...)
        params[f"w{i}"] = jax.random.uniform(
            keys[2 * (i - 1)], (din, dout), jnp.float32, minval=-bound, maxval=bound)
        params[f"b{i}"] = jax.random.uniform(
            keys[2 * (i - 1) + 1], (dout,), jnp.float32, minval=-bound, maxval=bound)
    return params


def pack_params(params):
    """Pack all weights/biases into one (424, 128) f32 slab (single DMA into VMEM)."""
    slab = jnp.zeros((SLAB_ROWS, LANES), jnp.float32)
    slab = slab.at[_W1_OFF:_W1_OFF + 4,   0:16].set(params["w1"])   # (4, 16)
    slab = slab.at[_W2_OFF:_W2_OFF + 16,  0:32].set(params["w2"])   # (16, 32)
    slab = slab.at[_W3_OFF:_W3_OFF + 32,  0:16].set(params["w3"])   # (32, 16)
    slab = slab.at[_W4_OFF:_W4_OFF + 16,  0:OUT_DIM].set(params["w4"])  # (16, 2)
    slab = slab.at[_B1_OFF, 0:16].set(params["b1"])
    slab = slab.at[_B2_OFF, 0:32].set(params["b2"])
    slab = slab.at[_B3_OFF, 0:16].set(params["b3"])
    slab = slab.at[_B4_OFF, 0:OUT_DIM].set(params["b4"])
    return slab


# ---------------------------------------------------------------------------
# Pure-JAX reference
# ---------------------------------------------------------------------------
def reference_forward(state, params):
    h = jnp.tanh(state @ params["w1"] + params["b1"])
    h = jnp.tanh(h @ params["w2"] + params["b2"])
    h = jnp.tanh(h @ params["w3"] + params["b3"])
    out = h @ params["w4"] + params["b4"]
    return out[:, 0:1], jax.nn.softplus(out[:, 1:2])


if __name__ == "__main__":
    key = jax.random.PRNGKey(0)
    k_state, k_params = jax.random.split(key)

    params = init_params(k_params)
    slab = pack_params(params)

    # Small batch (typical PPO inference path).
    B = 8
    state = jax.random.normal(k_state, (B, N_STATES), jnp.float32)
    mean, std = actor_net_forward(state, slab)
    jax.block_until_ready((mean, std))

    ref_mean, ref_std = reference_forward(state, params)
    assert mean.shape == (B, 1) and std.shape == (B, 1)
    assert jnp.allclose(mean, ref_mean, atol=1e-5, rtol=1e-5)
    assert jnp.allclose(std, ref_std, atol=1e-5, rtol=1e-5)
    assert bool(jnp.all(std > 0))

    # Non-divisible batch exercises the padded / multi-step grid path.
    B2 = 20
    state2 = jax.random.normal(jax.random.fold_in(k_state, 1), (B2, N_STATES), jnp.float32)
    mean2, std2 = actor_net_forward(state2, slab)
    jax.block_until_ready((mean2, std2))
    ref_mean2, ref_std2 = reference_forward(state2, params)
    assert mean2.shape == (B2, 1) and std2.shape == (B2, 1)
    assert jnp.allclose(mean2, ref_mean2, atol=1e-5, rtol=1e-5)
    assert jnp.allclose(std2, ref_std2, atol=1e-5, rtol=1e-5)

    print("KERNEL_OK")
</pallas_src>

<mosaic_0001>
module attributes {stable_mosaic.version = 11 : i64} {
  func.func @actor_kernel(%arg0: i32, %arg1: memref<8x4xf32, #tpu.memory_space<vmem>>, %arg2: memref<424x128xf32, #tpu.memory_space<vmem>>, %arg3: memref<8x2xf32, #tpu.memory_space<vmem>>) attributes {dimension_semantics = [#tpu.dimension_semantics<parallel>], iteration_bounds = array<i64: 1>, scalar_prefetch = 0 : i64, scratch_operands = 0 : i64, tpu.core_type = #tpu.core_type<tc>, window_params = [{transform_indices = @transform_0, window_bounds = array<i64: 8, 4>}, {pipeline_mode = #tpu.pipeline_mode<synchronous>, transform_indices = @transform_1, window_bounds = array<i64: 424, 128>}, {transform_indices = @transform_2, window_bounds = array<i64: 8, 2>}]} {
    %c0 = arith.constant 0 : index
    %c0_0 = arith.constant 0 : index
    %0 = vector.load %arg1[%c0, %c0_0] : memref<8x4xf32, #tpu.memory_space<vmem>>, vector<8x4xf32>
    %c0_1 = arith.constant 0 : index
    %c0_2 = arith.constant 0 : index
    %1 = vector.load %arg2[%c0_1, %c0_2] : memref<424x128xf32, #tpu.memory_space<vmem>>, vector<4x128xf32>
    %c8 = arith.constant 8 : index
    %c0_3 = arith.constant 0 : index
    %2 = vector.load %arg2[%c8, %c0_3] : memref<424x128xf32, #tpu.memory_space<vmem>>, vector<128x128xf32>
    %c136 = arith.constant 136 : index
    %c0_4 = arith.constant 0 : index
    %3 = vector.load %arg2[%c136, %c0_4] : memref<424x128xf32, #tpu.memory_space<vmem>>, vector<128x128xf32>
    %c264 = arith.constant 264 : index
    %c0_5 = arith.constant 0 : index
    %4 = vector.load %arg2[%c264, %c0_5] : memref<424x128xf32, #tpu.memory_space<vmem>>, vector<128x128xf32>
    %c392 = arith.constant 392 : index
    %c0_6 = arith.constant 0 : index
    %5 = vector.load %arg2[%c392, %c0_6] : memref<424x128xf32, #tpu.memory_space<vmem>>, vector<1x128xf32>
    %c400 = arith.constant 400 : index
    %c0_7 = arith.constant 0 : index
    %6 = vector.load %arg2[%c400, %c0_7] : memref<424x128xf32, #tpu.memory_space<vmem>>, vector<1x128xf32>
    %c408 = arith.constant 408 : index
    %c0_8 = arith.constant 0 : index
    %7 = vector.load %arg2[%c408, %c0_8] : memref<424x128xf32, #tpu.memory_space<vmem>>, vector<1x128xf32>
    %c416 = arith.constant 416 : index
    %c0_9 = arith.constant 0 : index
    %8 = vector.load %arg2[%c416, %c0_9] : memref<424x128xf32, #tpu.memory_space<vmem>>, vector<1x128xf32>
    %cst = arith.constant dense<0.000000e+00> : vector<8x128xf32>
    %9 = tpu.matmul %0, %1, %cst {dimension_numbers = #tpu.dot_dimension_numbers<[1], [0], [0], [1], [0, 0, 1, 1], [], []>} : vector<8x4xf32>, vector<4x128xf32>, vector<8x128xf32> -> vector<8x128xf32>
    %10 = vector.broadcast %5 : vector<1x128xf32> to vector<8x128xf32>
    %11 = arith.addf %9, %10 : vector<8x128xf32>
    %12 = math.tanh %11 : vector<8x128xf32>
    %cst_10 = arith.constant dense<0.000000e+00> : vector<8x128xf32>
    %13 = tpu.matmul %12, %2, %cst_10 {dimension_numbers = #tpu.dot_dimension_numbers<[1], [0], [0], [1], [0, 0, 1, 1], [], []>} : vector<8x128xf32>, vector<128x128xf32>, vector<8x128xf32> -> vector<8x128xf32>
    %14 = vector.broadcast %6 : vector<1x128xf32> to vector<8x128xf32>
    %15 = arith.addf %13, %14 : vector<8x128xf32>
    %16 = math.tanh %15 : vector<8x128xf32>
    %cst_11 = arith.constant dense<0.000000e+00> : vector<8x128xf32>
    %17 = tpu.matmul %16, %3, %cst_11 {dimension_numbers = #tpu.dot_dimension_numbers<[1], [0], [0], [1], [0, 0, 1, 1], [], []>} : vector<8x128xf32>, vector<128x128xf32>, vector<8x128xf32> -> vector<8x128xf32>
    %18 = vector.broadcast %7 : vector<1x128xf32> to vector<8x128xf32>
    %19 = arith.addf %17, %18 : vector<8x128xf32>
    %20 = math.tanh %19 : vector<8x128xf32>
    %cst_12 = arith.constant dense<0.000000e+00> : vector<8x128xf32>
    %21 = tpu.matmul %20, %4, %cst_12 {dimension_numbers = #tpu.dot_dimension_numbers<[1], [0], [0], [1], [0, 0, 1, 1], [], []>} : vector<8x128xf32>, vector<128x128xf32>, vector<8x128xf32> -> vector<8x128xf32>
    %22 = vector.broadcast %8 : vector<1x128xf32> to vector<8x128xf32>
    %23 = arith.addf %21, %22 : vector<8x128xf32>
    %24 = vector.extract_strided_slice %23 {offsets = [0, 0], sizes = [8, 2], strides = [1, 1]} : vector<8x128xf32> to vector<8x2xf32>
    %cst_13 = arith.constant 0.000000e+00 : f32
    %25 = vector.broadcast %cst_13 : f32 to vector<8x2xf32>
    %26 = arith.maximumf %24, %25 : vector<8x2xf32>
    %27 = math.absf %24 : vector<8x2xf32>
    %cst_14 = arith.constant 0.000000e+00 : f32
    %28 = vector.broadcast %cst_14 : f32 to vector<8x2xf32>
    %29 = arith.subf %28, %27 : vector<8x2xf32>
    %30 = math.exp %29 : vector<8x2xf32>
    %cst_15 = arith.constant 1.000000e+00 : f32
    %31 = vector.broadcast %cst_15 : f32 to vector<8x2xf32>
    %32 = arith.addf %31, %30 : vector<8x2xf32>
    %33 = math.log %32 : vector<8x2xf32>
    %34 = arith.addf %26, %33 : vector<8x2xf32>
    %35 = tpu.iota {dimensions = array<i32: 1>} : vector<8x2xi32>
    %c1_i32 = arith.constant 1 : i32
    %36 = vector.broadcast %c1_i32 : i32 to vector<8x2xi32>
    %37 = arith.cmpi eq, %35, %36 : vector<8x2xi32>
    %38 = arith.select %37, %34, %24 : vector<8x2xi1>, vector<8x2xf32>
    %c0_16 = arith.constant 0 : index
    %c0_17 = arith.constant 0 : index
    %39 = vector.load %arg3[%c0_16, %c0_17] : memref<8x2xf32, #tpu.memory_space<vmem>>, vector<8x2xf32>
    tpu.vector_store %arg3[%c0_16, %c0_17], %38 {strides = array<i32>} : memref<8x2xf32, #tpu.memory_space<vmem>>, vector<8x2xf32>,
    return
  }
  func.func @transform_0(%arg0: i32) -> (i32, i32) {
    %c0_i32 = arith.constant 0 : i32
    %c0_i32_0 = arith.constant 0 : i32
    return %arg0, %c0_i32 : i32, i32
  }
  func.func @transform_1(%arg0: i32) -> (i32, i32) {
    %c0_i32 = arith.constant 0 : i32
    %c0_i32_0 = arith.constant 0 : i32
    %c0_i32_1 = arith.constant 0 : i32
    return %c0_i32, %c0_i32_0 : i32, i32
  }
  func.func @transform_2(%arg0: i32) -> (i32, i32) {
    %c0_i32 = arith.constant 0 : i32
    %c0_i32_0 = arith.constant 0 : i32
    return %arg0, %c0_i32 : i32, i32
  }
}

</mosaic_0001>

<bundles_post_ra>
// kernel: tpu_custom_call.1
= control target key start
LH: loop header
LB: loop body
LE: loop exit
PB: predicated region body
PF: predicated region fallthrough
CT: control target
= control target key end

     0   :  { %7 = vsyncpa [#allocation3], 0  ;;  %s687_s9 = smov [#allocation2]   ;;  %s759_s0 = inlined_call_operand.vmem [shape: f32[8,4], index: 0, kind: input, shape index: {}]   ;;  %s760_s1 = inlined_call_operand.hbm [shape: f32[424,128], index: 1, kind: input, shape index: {}]   ;;  %s761_s2 = inlined_call_operand.vmem [shape: f32[8,2], index: 2, kind: output, shape index: {}]  }
   0x1   :  { %s15_s10 = sshll.u32 %s687_s9, 4  ;;  %s663_s13 = scalar_lea.hbm %s760_s1, 6784  ;;  %s16_s10 = int_to_ptr.vmem [resolvable:$true] %s15_s10 }
   0x2   :  { %p664_p0 = scmp.ne.s32.totalorder %s760_s1, %s663_s13  ;;  %p667_p1 = scmp.lt.u32.totalorder %s663_s13, %s760_s1 }
   0x4   :  { %p669_p2 = pnand %p667_p1, %p664_p0 }
   0x6   :  { %672 = shalt.err (!%p669_p2)
}
   0x7   :  { %s673_s18 = scalar_lea.vmem %s16_s10, 6784  ;;  %p678_p4 = scmp.lt.s32.totalorder %s16_s10, %s16_s10 }
   0x8   :  { %p674_p3 = scmp.ne.s32.totalorder %s16_s10, %s673_s18  ;;  %p679_p5 = scmp.lt.s32.totalorder %s673_s18, %s673_s18 }
   0xa   :  { %p680_p6 = por %p679_p5, %p678_p4 }
   0xc   :  { %p681_p7 = pnand %p680_p6, %p674_p3 }
   0xe   :  { %684 = shalt.err (!%p681_p7)
}
   0xf   :  { %s688_s19 = smov 128   ;;  %s689_s20 = smov 8  }
  0x10   :  { %21 = dma.hbm_to_vmem [thread:$0]  %s760_s1, 6784, %s16_s10, [#allocation3], %s688_s19, %s688_s19, %s689_s20  }
  0x11   :  { %685 = dma.done.wait [#allocation3], 6784  }
  0x12   :  { %686 = vsyncadd [#allocation3], 4294960512  ;;  %v690_v0 = vmov 0.0   ;;  %vm691_vm0 = vmmov 0   ;;  %v692_v1 = vmov 0.0|0.0   ;;  %vm87_vm1 = vcmask 1043456  }
  0x13   :  { %465 = vmatprep.subr.mxu0 %v690_v0  ;;  %467 = vmatprep.mubr.msk.f32.mxu0 %vm691_vm0, %v690_v0  ;;  %vm83_vm2 = vcmask 31744   ;;  %v26_v2 = vld [vmem:[#allocation2] sm:$0xf]  ;;  %v27_v4 = vld [vmem:[#allocation2 + $0x8] sm:$0xff]  ;;  %v28_v5 = vld [vmem:[#allocation2 + $0x10] sm:$0xff]  ;;  %vm399_vm4 = vcmask 15360  }
  0x14   :  { %575 = vmatprep.subr.bf16.mxu1 %v692_v1  ;;  %502 = vmatprep.mubr.msk.f32.mxu1 %vm691_vm0, %v690_v0  ;;  %v25_v3 = vld [vmem:[%s759_s0] sm:$0xff]  ;;  %v29_v6 = vld [vmem:[#allocation2 + $0x18] sm:$0xff]  ;;  %v576_v8 = vpack.c.bf16 %v28_v5, %v27_v4  ;;  %v31_v10 = vld [vmem:[#allocation2 + $0x28] sm:$0xff] }
  0x15   :  { %466 = vmatpush3.msk.msra.mxu0 %vm87_vm1, %v26_v2  ;;  %v30_v7 = vld [vmem:[#allocation2 + $0x20] sm:$0xff]  ;;  %v32_v11 = vld [vmem:[#allocation2 + $0x30] sm:$0xff]  ;;  %v33_v13 = vld [vmem:[#allocation2 + $0x38] sm:$0xff] }
  0x16   :  { %468 = vmatmul.mubr.msk.f32.vlgmr.msra.gmra.mrb[0].mxu0 %vm83_vm2, %v25_v3  ;;  %599 = vmatprep.subr.bf16.mxu0 %v692_v1  ;;  %v579_v9 = vpack.c.bf16 %v30_v7, %v29_v6  ;;  %v582_v12 = vpack.c.bf16 %v32_v11, %v31_v10  ;;  %v34_v14 = vld [vmem:[#allocation2 + $0x40] sm:$0xff]  ;;  %v35_v16 = vld [vmem:[#allocation2 + $0x48] sm:$0xff]  ;;  %v36_v17 = vld [vmem:[#allocation2 + $0x50] sm:$0xff] }
  0x17   :  { %537 = vmatprep.mubr.msk.f32.mxu0 %vm691_vm0, %v690_v0  ;;  %577 = vmatpush3.bf16.msra.mxu1 %v576_v8  ;;  %v585_v15 = vpack.c.bf16 %v34_v14, %v33_v13  ;;  %v588_v18 = vpack.c.bf16 %v36_v17, %v35_v16  ;;  %v37_v19 = vld [vmem:[#allocation2 + $0x58] sm:$0xff]  ;;  %v38_v20 = vld [vmem:[#allocation2 + $0x60] sm:$0xff]  ;;  %v39_v22 = vld [vmem:[#allocation2 + $0x68] sm:$0xff] }
  0x18   :  { %578 = vmatprep.subr.bf16.mxu1 %v692_v1  ;;  %v591_v21 = vpack.c.bf16 %v38_v20, %v37_v19  ;;  %v40_v23 = vld [vmem:[#allocation2 + $0x70] sm:$0xff]  ;;  %v41_v25 = vld [vmem:[#allocation2 + $0x78] sm:$0xff]  ;;  %v42_v26 = vld [vmem:[#allocation2 + $0x80] sm:$0xff] }
  0x19   :  { %v594_v24 = vpack.c.bf16 %v40_v23, %v39_v22  ;;  %v597_v27 = vpack.c.bf16 %v42_v26, %v41_v25  ;;  %v43_v28 = vld [vmem:[#allocation2 + $0x88] sm:$0xff]  ;;  %v44_v29 = vld [vmem:[#allocation2 + $0x90] sm:$0xff]  ;;  %v45_v30 = vld [vmem:[#allocation2 + $0x98] sm:$0xff] }
  0x1a   :  { %v600_v31 = vpack.c.bf16 %v44_v29, %v43_v28  ;;  %v46_v32 = vld [vmem:[#allocation2 + $0xa0] sm:$0xff]  ;;  %v47_v34 = vld [vmem:[#allocation2 + $0xa8] sm:$0xff]  ;;  %v48_v35 = vld [vmem:[#allocation2 + $0xb0] sm:$0xff] }
  0x1b   :  { %580 = vmatpush3.bf16.msra.mxu1 %v579_v9  ;;  %v603_v33 = vpack.c.bf16 %v46_v32, %v45_v30  ;;  %v606_v36 = vpack.c.bf16 %v48_v35, %v47_v34  ;;  %v49_v37 = vld [vmem:[#allocation2 + $0xb8] sm:$0xff]  ;;  %v50_v38 = vld [vmem:[#allocation2 + $0xc0] sm:$0xff]  ;;  %v51_v40 = vld [vmem:[#allocation2 + $0xc8] sm:$0xff] }
  0x1c   :  { %581 = vmatprep.subr.bf16.mxu1 %v692_v1  ;;  %601 = vmatpush3.bf16.msra.mxu0 %v600_v31  ;;  %v609_v39 = vpack.c.bf16 %v50_v38, %v49_v37  ;;  %v52_v41 = vld [vmem:[#allocation2 + $0xd0] sm:$0xff]  ;;  %v406_v43 = vld [vmem:[#allocation2 + $0x188] ss:$0 sm:$0xff]  ;;  %v53_v48 = vld [vmem:[#allocation2 + $0xd8] sm:$0xff] }
  0x1d   :  { %602 = vmatprep.subr.bf16.mxu0 %v692_v1  ;;  %v612_v42 = vpack.c.bf16 %v52_v41, %v51_v40  ;;  %v54_v49 = vld [vmem:[#allocation2 + $0xe0] sm:$0xff]  ;;  %v55_v51 = vld [vmem:[#allocation2 + $0xe8] sm:$0xff]  ;;  %v56_v52 = vld [vmem:[#allocation2 + $0xf0] sm:$0xff] }
  0x1e   :  { %v615_v50 = vpack.c.bf16 %v54_v49, %v53_v48  ;;  %v618_v53 = vpack.c.bf16 %v56_v52, %v55_v51  ;;  %v57_v54 = vld [vmem:[#allocation2 + $0xf8] sm:$0xff]  ;;  %v58_v55 = vld [vmem:[#allocation2 + $0x100] sm:$0xff]  ;;  %v59_v57 = vld [vmem:[#allocation2 + $0x108] sm:$0xff] }
  0x1f   :  { %583 = vmatpush3.bf16.msra.mxu1 %v582_v12  ;;  %v621_v56 = vpack.c.bf16 %v58_v55, %v57_v54  ;;  %v60_v58 = vld [vmem:[#allocation2 + $0x110] sm:$0xff]  ;;  %v61_v59 = vld [vmem:[#allocation2 + $0x118] sm:$0xff]  ;;  %v62_v61 = vld [vmem:[#allocation2 + $0x120] sm:$0xff] }
  0x20   :  { %584 = vmatprep.subr.bf16.mxu1 %v692_v1  ;;  %604 = vmatpush3.bf16.msra.mxu0 %v603_v33  ;;  %v624_v60 = vpack.c.bf16 %v60_v58, %v59_v57  ;;  %v627_v62 = vpack.c.bf16 %v62_v61, %v61_v59  ;;  %v63_v63 = vld [vmem:[#allocation2 + $0x128] sm:$0xff]  ;;  %v65_v3 = vld [vmem:[#allocation2 + $0x138] sm:$0xff]  ;;  %v66_v4 = vld [vmem:[#allocation2 + $0x140] sm:$0xff] }
  0x21   :  { %605 = vmatprep.subr.bf16.mxu0 %v692_v1  ;;  %v633_v5 = vpack.c.bf16 %v66_v4, %v65_v3  ;;  %v67_v6 = vld [vmem:[#allocation2 + $0x148] sm:$0xff]  ;;  %v68_v7 = vld [vmem:[#allocation2 + $0x150] sm:$0xff]  ;;  %v69_v14 = vld [vmem:[#allocation2 + $0x158] sm:$0xff] }
  0x22   :  { %v636_v8 = vpack.c.bf16 %v68_v7, %v67_v6  ;;  %v409_v9 = vld [vmem:[#allocation2 + $0x190] ss:$0 sm:$0xff]  ;;  %v71_v17 = vld [vmem:[#allocation2 + $0x168] sm:$0xff]  ;;  %v73_v20 = vld [vmem:[#allocation2 + $0x178] sm:$0xff] }
  0x23   :  { %586 = vmatpush3.bf16.msra.mxu1 %v585_v15  ;;  %v70_v15 = vld [vmem:[#allocation2 + $0x160] sm:$0xff]  ;;  %v410_v23 = vld [vmem:[#allocation2 + $0x198] ss:$0 sm:$0xff] }
  0x24   :  { %587 = vmatprep.subr.bf16.mxu1 %v692_v1  ;;  %607 = vmatpush3.bf16.msra.mxu0 %v606_v36  ;;  %v639_v16 = vpack.c.bf16 %v70_v15, %v69_v14  ;;  %v411_v28 = vld [vmem:[#allocation2 + $0x1a0] ss:$0 sm:$0xff] }
  0x25   :  { %608 = vmatprep.subr.bf16.mxu0 %v692_v1 }
  0x27   :  { %589 = vmatpush3.bf16.msra.mxu1 %v588_v18  ;;  %v72_v18 = vld [vmem:[#allocation2 + $0x170] sm:$0xff] }
  0x28   :  { %590 = vmatprep.subr.bf16.mxu1 %v692_v1  ;;  %610 = vmatpush3.bf16.msra.mxu0 %v609_v39  ;;  %v642_v19 = vpack.c.bf16 %v72_v18, %v71_v17 }
  0x29   :  { %611 = vmatprep.subr.bf16.mxu0 %v692_v1 }
  0x2b   :  { %592 = vmatpush3.bf16.msra.mxu1 %v591_v21  ;;  %v74_v21 = vld [vmem:[#allocation2 + $0x180] sm:$0xff] }
  0x2c   :  { %593 = vmatprep.subr.bf16.mxu1 %v692_v1  ;;  %613 = vmatpush3.bf16.msra.mxu0 %v612_v42  ;;  %v645_v22 = vpack.c.bf16 %v74_v21, %v73_v20 }
  0x2d   :  { %614 = vmatprep.subr.bf16.mxu0 %v692_v1 }
  0x2f   :  { %595 = vmatpush3.bf16.msra.mxu1 %v594_v24 }
  0x30   :  { %596 = vmatprep.subr.bf16.mxu1 %v692_v1  ;;  %616 = vmatpush3.bf16.msra.mxu0 %v615_v50 }
  0x31   :  { %617 = vmatprep.subr.bf16.mxu0 %v692_v1 }
  0x33   :  { %598 = vmatpush3.bf16.msra.mxu1 %v597_v27 }
  0x34   :  { %623 = vmatprep.subr.bf16.mxu1 %v692_v1  ;;  %619 = vmatpush3.bf16.msra.mxu0 %v618_v53 }
  0x35   :  { %620 = vmatprep.subr.bf16.mxu0 %v692_v1 }
  0x38   :  { %622 = vmatpush3.bf16.msra.mxu0 %v621_v56 }
  0xe9   :  { %v157_v44 = vpop.f32.mrb[0].mxu0 }
  0xea   :  { %v158_v45 = vadd.f32 %v406_v43, %v157_v44  ;;  %v469_v46 = vpop.f32.mrb[1].mxu0 }
  0xec   :  { %653 = vtanh.f32 %v158_v45 }
  0xf6   :  { %v654_v47 = vpop.eup %653 }
  0xf7   :  { %503 = vmatmul.mubr.f32.vlgmr.msra.gmra.mrb[0].mxu1 %v654_v47 }
  0xf8   :  { %572 = vmatprep.mubr.msk.f32.mxu1 %vm691_vm0, %v690_v0  ;;  %625 = vmatpush3.bf16.msra.mxu1 %v624_v60  ;;  %v64_v0 = vld [vmem:[#allocation2 + $0x130] sm:$0xff] }
  0xf9   :  { %626 = vmatprep.subr.bf16.mxu1 %v692_v1  ;;  %v630_v2 = vpack.c.bf16 %v64_v0, %v63_v63 }
  0xfc   :  { %628 = vmatpush3.bf16.msra.mxu1 %v627_v62 }
  0xfd   :  { %629 = vmatprep.subr.bf16.mxu1 %v692_v1 }
 0x100   :  { %631 = vmatpush3.bf16.msra.mxu1 %v630_v2 }
 0x101   :  { %632 = vmatprep.subr.bf16.mxu1 %v692_v1 }
 0x104   :  { %634 = vmatpush3.bf16.msra.mxu1 %v633_v5 }
 0x105   :  { %635 = vmatprep.subr.bf16.mxu1 %v692_v1 }
 0x108   :  { %637 = vmatpush3.bf16.msra.mxu1 %v636_v8 }
 0x109   :  { %638 = vmatprep.subr.bf16.mxu1 %v692_v1 }
 0x10c   :  { %640 = vmatpush3.bf16.msra.mxu1 %v639_v16 }
 0x10d   :  { %641 = vmatprep.subr.bf16.mxu1 %v692_v1 }
 0x110   :  { %643 = vmatpush3.bf16.msra.mxu1 %v642_v19 }
 0x111   :  { %644 = vmatprep.subr.bf16.mxu1 %v692_v1  ;;  %v395_v1 = vlaneseq }
 0x113   :  { %v396_v37 = vand.u32 127, %v395_v1 }
 0x114   :  { %646 = vmatpush3.bf16.msra.mxu1 %v645_v22 }
 0x115   :  { %vm397_vm3 = vcmp.eq.s32.totalorder %v396_v37, 1 }
 0x1ca   :  { %v232_v10 = vpop.f32.mrb[0].mxu1 }
 0x1cb   :  { %v233_v11 = vadd.f32 %v409_v9, %v232_v10  ;;  %v504_v12 = vpop.f32.mrb[1].mxu1 }
 0x1cd   :  { %655 = vtanh.f32 %v233_v11 }
 0x1d7   :  { %v656_v13 = vpop.eup %655 }
 0x1d8   :  { %538 = vmatmul.mubr.f32.vlgmr.msra.gmra.mrb[2].mxu0 %v656_v13 }
 0x2ab   :  { %v307_v24 = vpop.f32.mrb[2].mxu0 }
 0x2ac   :  { %v308_v25 = vadd.f32 %v410_v23, %v307_v24  ;;  %v539_v26 = vpop.f32.mrb[3].mxu0 }
 0x2ae   :  { %657 = vtanh.f32 %v308_v25 }
 0x2b8   :  { %v658_v27 = vpop.eup %657 }
 0x2b9   :  { %573 = vmatmul.mubr.f32.vlgmr.msra.gmra.mrb[2].mxu1 %v658_v27 }
 0x38c   :  { %v382_v29 = vpop.f32.mrb[2].mxu1 }
 0x38d   :  { %v383_v30 = vadd.f32 %v411_v28, %v382_v29  ;;  %v574_v31 = vpop.f32.mrb[3].mxu1 }
 0x38f   :  { %v387_v32 = vand.u32 2147483647, %v383_v30  ;;  %v386_v39 = vmax.f32 %v383_v30, 0.0 }
 0x391   :  { %v388_v33 = vsub.f32 0.0, %v387_v32 }
 0x393   :  { %v389_v34 = vmul.f32 1.442695, %v388_v33 }
 0x395   :  { %659 = vpow2.f32 %v389_v34 }
 0x39f   :  { %v660_v35 = vpop.eup %659 }
 0x3a0   :  { %v391_v36 = vadd.f32 1.0, %v660_v35 }
 0x3a2   :  { %661 = vlog2.f32 %v391_v36 }
 0x3ac   :  { %v662_v38 = vpop.eup %661 }
 0x3ad   :  { %v393_v40 = vmul.f32 0.6931472, %v662_v38 }
 0x3af   :  { %v394_v41 = vadd.f32 %v393_v40, %v386_v39 }
 0x3b1   :  { %v398_v42 = vsel %vm397_vm3, %v394_v41, %v383_v30 }
 0x3b2   :  { %400 = vst.msk [vmem:[%s761_s2] sm:$0xff] %vm399_vm4, %v398_v42 }
 0x3b3   :  { %405 = vsyncpa [#allocation3], 1 }

</bundles_post_ra>
